<compile_context>
chip_gen: v7x
topology: tpu7x:2x2x1
jax: 0.10.0
libtpu: 0.0.40
codegen_flags: <defaults>
</compile_context>

<pallas_src>
import jax
import jax.numpy as jnp
from jax.experimental import pallas as pl
from jax.experimental.pallas import tpu as pltpu


def _head_kernel(hist_ref, vis_ref, w1h_ref, w1v_ref, b1_ref, w2_ref, b2_ref, o_ref):
    """One row-tile of: masked linear -> relu -> masked linear -> (fused) output slice.

    hist_ref : (TM, E)      history tile
    vis_ref  : (TM, V)      visit tile
    w1h_ref  : (E, N)       (tril*W1)^T rows contracting the history part
    w1v_ref  : (V, N)       (tril*W1)^T rows contracting the visit part
    b1_ref   : (1, N)       f32
    w2_ref   : (N, Vpad)    (tril*W2)^T, columns [n_embd-1, N-1) zero-padded to lane multiple
    b2_ref   : (1, Vpad)    f32
    o_ref    : (TM, Vpad)
    """
    h = jnp.dot(hist_ref[...], w1h_ref[...], preferred_element_type=jnp.float32)
    h = h + jnp.dot(vis_ref[...], w1v_ref[...], preferred_element_type=jnp.float32)
    h = h + b1_ref[...]
    h = jnp.maximum(h, 0.0)
    y = jnp.dot(h.astype(w2_ref.dtype), w2_ref[...], preferred_element_type=jnp.float32)
    y = y + b2_ref[...]
    o_ref[...] = y.astype(o_ref.dtype)


def fine_autoregressive_head(history, input_visits, w1, b1, w2, b2, *,
                             n_embd, tile_m=256, compute_dtype=None):
    """history: (B, T, n_embd), input_visits: (B, T, vocab) -> (B, T-1, vocab)."""
    B, T, E = history.shape
    _, _, V = input_visits.shape
    assert E == n_embd, (E, n_embd)
    N = E + V
    vocab = V
    Tm1 = T - 1
    M = B * Tm1

    out_dtype = history.dtype
    cdt = jnp.dtype(compute_dtype) if compute_dtype is not None else jnp.dtype(out_dtype)

    # ---- call-constant weight prep (hoisted out of the kernel hot loop) ----
    # PyTorch: masked_w[o, i] = w[o, i] if i <= o else 0; F.linear does x @ masked_w^T + b.
    o_idx = jnp.arange(N)[:, None]
    i_idx = jnp.arange(N)[None, :]
    keep = i_idx <= o_idx
    w1mt = jnp.where(keep, w1, 0).T.astype(cdt)            # (N_in, N_out)
    w2mt = jnp.where(keep, w2, 0).T.astype(cdt)            # (N_in, N_out)
    w1mt_h = w1mt[:E, :]                                   # (E, N)
    w1mt_v = w1mt[E:, :]                                   # (V, N)
    w2mt_s = w2mt[:, n_embd - 1:N - 1]                     # (N, vocab)  <- fused output slice
    b1_2d = b1.reshape(1, N).astype(jnp.float32)
    b2_2d = b2[n_embd - 1:N - 1].reshape(1, vocab).astype(jnp.float32)

    # Lane-dense output: pad logit columns up to a multiple of 128 (unmasked stores).
    vpad = pl.cdiv(vocab, 128) * 128
    if vpad != vocab:
        w2mt_s = jnp.pad(w2mt_s, ((0, 0), (0, vpad - vocab)))
        b2_2d = jnp.pad(b2_2d, ((0, 0), (0, vpad - vocab)))

    # ---- activations: concat fused into the kernel; just flatten (B, T-1) -> M ----
    hist2d = history[:, :-1, :].reshape(M, E).astype(cdt)
    vis2d = input_visits[:, 1:, :].reshape(M, V).astype(cdt)

    # Sublane-align the row dimension if needed (cheap, skipped when already aligned).
    M_pad = pl.cdiv(M, 8) * 8
    if M_pad != M:
        hist2d = jnp.pad(hist2d, ((0, M_pad - M), (0, 0)))
        vis2d = jnp.pad(vis2d, ((0, M_pad - M), (0, 0)))

    # ---- row tiling ----
    tile = max(8, min(int(tile_m) // 8 * 8, M_pad))
    grid_m = pl.cdiv(M_pad, tile)

    # explicit VMEM budget: resident weights + double-buffered in/out tiles, with headroom
    itemsize = cdt.itemsize
    weight_bytes = (w1mt.size + w2mt_s.size) * itemsize + (b1_2d.size + b2_2d.size) * 4
    tile_bytes = 2 * tile * (E + V) * itemsize + 2 * tile * vpad * out_dtype.itemsize
    vmem_limit = int(min(48 * 1024 * 1024,
                         max(16 * 1024 * 1024, 4 * (weight_bytes + tile_bytes))))

    out2d = pl.pallas_call(
        _head_kernel,
        out_shape=jax.ShapeDtypeStruct((M_pad, vpad), out_dtype),
        grid=(grid_m,),
        in_specs=[
            pl.BlockSpec((tile, E), lambda i: (i, 0)),     # history tile
            pl.BlockSpec((tile, V), lambda i: (i, 0)),     # visit tile
            pl.BlockSpec((E, N), lambda i: (0, 0)),        # resident weights / biases:
            pl.BlockSpec((V, N), lambda i: (0, 0)),
            pl.BlockSpec((1, N), lambda i: (0, 0)),
            pl.BlockSpec((N, vpad), lambda i: (0, 0)),
            pl.BlockSpec((1, vpad), lambda i: (0, 0)),
        ],
        out_specs=pl.BlockSpec((tile, vpad), lambda i: (i, 0)),
        compiler_params=pltpu.CompilerParams(
            dimension_semantics=("parallel",),             # row tiles are independent
            vmem_limit_bytes=vmem_limit,
        ),
    )(hist2d, vis2d, w1mt_h, w1mt_v, b1_2d, w2mt_s, b2_2d)

    out2d = out2d[:M, :vocab] if (M_pad != M or vpad != vocab) else out2d
    return out2d.reshape(B, Tm1, vocab)


def _reference(history, input_visits, w1, b1, w2, b2, n_embd):
    """Pure-JAX reference mirroring the PyTorch module (f32)."""
    hist = history[:, :-1, :]
    vis = input_visits[:, 1:, :]
    x = jnp.concatenate([hist, vis], axis=-1)
    N = x.shape[-1]
    tril = jnp.tril(jnp.ones((N, N), dtype=x.dtype))
    h = jnp.maximum(x @ (tril * w1).T + b1, 0.0)
    y = h @ (tril * w2).T + b2
    return y[:, :, n_embd - 1:N - 1]


if __name__ == "__main__":
    # config: n_embd=32, total_vocab_size=96 -> N = 128 (lane aligned)
    n_embd = 32
    total_vocab = 96
    N = n_embd + total_vocab
    B, T = 2, 9  # -> M = B*(T-1) = 16 rows

    key = jax.random.PRNGKey(0)
    k_h, k_v, k_w1, k_b1, k_w2, k_b2 = jax.random.split(key, 6)

    history = jax.random.normal(k_h, (B, T, n_embd), dtype=jnp.float32)
    input_visits = jax.random.normal(k_v, (B, T, total_vocab), dtype=jnp.float32)

    # PyTorch Linear layout: weight[out, in], bias[out]
    bound = 1.0 / (N ** 0.5)
    w1 = jax.random.uniform(k_w1, (N, N), jnp.float32, -bound, bound)
    b1 = jax.random.uniform(k_b1, (N,), jnp.float32, -bound, bound)
    w2 = jax.random.uniform(k_w2, (N, N), jnp.float32, -bound, bound)
    b2 = jax.random.uniform(k_b2, (N,), jnp.float32, -bound, bound)

    head = jax.jit(fine_autoregressive_head,
                   static_argnames=("n_embd", "tile_m", "compute_dtype"))

    ref = _reference(history, input_visits, w1, b1, w2, b2, n_embd)

    # f32 path, single row tile
    out = jax.block_until_ready(
        head(history, input_visits, w1, b1, w2, b2, n_embd=n_embd))
    assert out.shape == (B, T - 1, total_vocab), out.shape
    assert jnp.allclose(out, ref, atol=1e-4, rtol=1e-4), "f32 mismatch vs reference"

    # f32 path, multi-tile grid (exercises M tiling with resident weights)
    out_t = jax.block_until_ready(
        head(history, input_visits, w1, b1, w2, b2, n_embd=n_embd, tile_m=8))
    assert jnp.allclose(out_t, ref, atol=1e-4, rtol=1e-4), "tiled mismatch vs reference"

    # bf16 compute path (v6e/v7x MXU), f32 accumulation — looser tolerance by construction
    out_bf = jax.block_until_ready(
        head(history, input_visits, w1, b1, w2, b2, n_embd=n_embd,
             compute_dtype=jnp.bfloat16))
    assert out_bf.shape == (B, T - 1, total_vocab)
    assert jnp.allclose(out_bf, ref, atol=2e-1, rtol=2e-1), "bf16 path diverged too far"

    print("KERNEL_OK")
</pallas_src>

<mosaic_0001>
module attributes {stable_mosaic.version = 11 : i64} {
  func.func @_head_kernel(%arg0: i32, %arg1: memref<16x32xf32, #tpu.memory_space<vmem>>, %arg2: memref<16x96xf32, #tpu.memory_space<vmem>>, %arg3: memref<32x128xf32, #tpu.memory_space<vmem>>, %arg4: memref<96x128xf32, #tpu.memory_space<vmem>>, %arg5: memref<1x128xf32, #tpu.memory_space<vmem>>, %arg6: memref<128x128xf32, #tpu.memory_space<vmem>>, %arg7: memref<1x128xf32, #tpu.memory_space<vmem>>, %arg8: memref<16x128xf32, #tpu.memory_space<vmem>>) attributes {dimension_semantics = [#tpu.dimension_semantics<parallel>], iteration_bounds = array<i64: 1>, scalar_prefetch = 0 : i64, scratch_operands = 0 : i64, tpu.core_type = #tpu.core_type<tc>, window_params = [{transform_indices = @transform_0, window_bounds = array<i64: 16, 32>}, {transform_indices = @transform_1, window_bounds = array<i64: 16, 96>}, {pipeline_mode = #tpu.pipeline_mode<synchronous>, transform_indices = @transform_2, window_bounds = array<i64: 32, 128>}, {pipeline_mode = #tpu.pipeline_mode<synchronous>, transform_indices = @transform_3, window_bounds = array<i64: 96, 128>}, {pipeline_mode = #tpu.pipeline_mode<synchronous>, transform_indices = @transform_4, window_bounds = array<i64: 1, 128>}, {pipeline_mode = #tpu.pipeline_mode<synchronous>, transform_indices = @transform_5, window_bounds = array<i64: 128, 128>}, {pipeline_mode = #tpu.pipeline_mode<synchronous>, transform_indices = @transform_6, window_bounds = array<i64: 1, 128>}, {transform_indices = @transform_7, window_bounds = array<i64: 16, 128>}]} {
    %c0 = arith.constant 0 : index
    %c0_0 = arith.constant 0 : index
    %0 = vector.load %arg1[%c0, %c0_0] : memref<16x32xf32, #tpu.memory_space<vmem>>, vector<16x32xf32>
    %c0_1 = arith.constant 0 : index
    %c0_2 = arith.constant 0 : index
    %1 = vector.load %arg3[%c0_1, %c0_2] : memref<32x128xf32, #tpu.memory_space<vmem>>, vector<32x128xf32>
    %cst = arith.constant dense<0.000000e+00> : vector<16x128xf32>
    %2 = tpu.matmul %0, %1, %cst {dimension_numbers = #tpu.dot_dimension_numbers<[1], [0], [0], [1], [0, 0, 1, 1], [], []>} : vector<16x32xf32>, vector<32x128xf32>, vector<16x128xf32> -> vector<16x128xf32>
    %c0_3 = arith.constant 0 : index
    %c0_4 = arith.constant 0 : index
    %3 = vector.load %arg2[%c0_3, %c0_4] : memref<16x96xf32, #tpu.memory_space<vmem>>, vector<16x96xf32>
    %c0_5 = arith.constant 0 : index
    %c0_6 = arith.constant 0 : index
    %4 = vector.load %arg4[%c0_5, %c0_6] : memref<96x128xf32, #tpu.memory_space<vmem>>, vector<96x128xf32>
    %cst_7 = arith.constant dense<0.000000e+00> : vector<16x128xf32>
    %5 = tpu.matmul %3, %4, %cst_7 {dimension_numbers = #tpu.dot_dimension_numbers<[1], [0], [0], [1], [0, 0, 1, 1], [], []>} : vector<16x96xf32>, vector<96x128xf32>, vector<16x128xf32> -> vector<16x128xf32>
    %6 = arith.addf %2, %5 : vector<16x128xf32>
    %c0_8 = arith.constant 0 : index
    %c0_9 = arith.constant 0 : index
    %7 = vector.load %arg5[%c0_8, %c0_9] : memref<1x128xf32, #tpu.memory_space<vmem>>, vector<1x128xf32>
    %8 = vector.broadcast %7 : vector<1x128xf32> to vector<16x128xf32>
    %9 = arith.addf %6, %8 : vector<16x128xf32>
    %cst_10 = arith.constant 0.000000e+00 : f32
    %10 = vector.broadcast %cst_10 : f32 to vector<16x128xf32>
    %11 = arith.maximumf %9, %10 : vector<16x128xf32>
    %c0_11 = arith.constant 0 : index
    %c0_12 = arith.constant 0 : index
    %12 = vector.load %arg6[%c0_11, %c0_12] : memref<128x128xf32, #tpu.memory_space<vmem>>, vector<128x128xf32>
    %cst_13 = arith.constant dense<0.000000e+00> : vector<16x128xf32>
    %13 = tpu.matmul %11, %12, %cst_13 {dimension_numbers = #tpu.dot_dimension_numbers<[1], [0], [0], [1], [0, 0, 1, 1], [], []>} : vector<16x128xf32>, vector<128x128xf32>, vector<16x128xf32> -> vector<16x128xf32>
    %c0_14 = arith.constant 0 : index
    %c0_15 = arith.constant 0 : index
    %14 = vector.load %arg7[%c0_14, %c0_15] : memref<1x128xf32, #tpu.memory_space<vmem>>, vector<1x128xf32>
    %15 = vector.broadcast %14 : vector<1x128xf32> to vector<16x128xf32>
    %16 = arith.addf %13, %15 : vector<16x128xf32>
    %c0_16 = arith.constant 0 : index
    %c0_17 = arith.constant 0 : index
    %17 = vector.load %arg8[%c0_16, %c0_17] : memref<16x128xf32, #tpu.memory_space<vmem>>, vector<16x128xf32>
    tpu.vector_store %arg8[%c0_16, %c0_17], %16 {strides = array<i32>} : memref<16x128xf32, #tpu.memory_space<vmem>>, vector<16x128xf32>,
    return
  }
  func.func @transform_0(%arg0: i32) -> (i32, i32) {
    %c0_i32 = arith.constant 0 : i32
    %c0_i32_0 = arith.constant 0 : i32
    return %arg0, %c0_i32 : i32, i32
  }
  func.func @transform_1(%arg0: i32) -> (i32, i32) {
    %c0_i32 = arith.constant 0 : i32
    %c0_i32_0 = arith.constant 0 : i32
    return %arg0, %c0_i32 : i32, i32
  }
  func.func @transform_2(%arg0: i32) -> (i32, i32) {
    %c0_i32 = arith.constant 0 : i32
    %c0_i32_0 = arith.constant 0 : i32
    %c0_i32_1 = arith.constant 0 : i32
    return %c0_i32, %c0_i32_0 : i32, i32
  }
  func.func @transform_3(%arg0: i32) -> (i32, i32) {
    %c0_i32 = arith.constant 0 : i32
    %c0_i32_0 = arith.constant 0 : i32
    %c0_i32_1 = arith.constant 0 : i32
    return %c0_i32, %c0_i32_0 : i32, i32
  }
  func.func @transform_4(%arg0: i32) -> (i32, i32) {
    %c0_i32 = arith.constant 0 : i32
    %c0_i32_0 = arith.constant 0 : i32
    %c0_i32_1 = arith.constant 0 : i32
    return %c0_i32, %c0_i32_0 : i32, i32
  }
  func.func @transform_5(%arg0: i32) -> (i32, i32) {
    %c0_i32 = arith.constant 0 : i32
    %c0_i32_0 = arith.constant 0 : i32
    %c0_i32_1 = arith.constant 0 : i32
    return %c0_i32, %c0_i32_0 : i32, i32
  }
  func.func @transform_6(%arg0: i32) -> (i32, i32) {
    %c0_i32 = arith.constant 0 : i32
    %c0_i32_0 = arith.constant 0 : i32
    %c0_i32_1 = arith.constant 0 : i32
    return %c0_i32, %c0_i32_0 : i32, i32
  }
  func.func @transform_7(%arg0: i32) -> (i32, i32) {
    %c0_i32 = arith.constant 0 : i32
    %c0_i32_0 = arith.constant 0 : i32
    return %arg0, %c0_i32 : i32, i32
  }
}

</mosaic_0001>

<bundles_post_ra>
// kernel: fine_autoregressive_head.1
= control target key start
LH: loop header
LB: loop body
LE: loop exit
PB: predicated region body
PF: predicated region fallthrough
CT: control target
= control target key end

     0   :  { %vm46_vm0 = vcmask 785408   ;;  %vm128_vm1 = vcmask 261120   ;;  %s670_s3 = inlined_call_operand.vmem [shape: f32[96,128], index: 3, kind: input, shape index: {}]   ;;  %s671_s1 = inlined_call_operand.vmem [shape: f32[16,96], index: 1, kind: input, shape index: {}]   ;;  %s672_s5 = inlined_call_operand.vmem [shape: f32[128,128], index: 5, kind: input, shape index: {}]   ;;  %s673_s2 = inlined_call_operand.vmem [shape: f32[32,128], index: 2, kind: input, shape index: {}]   ;;  %s674_s0 = inlined_call_operand.vmem [shape: f32[16,32], index: 0, kind: input, shape index: {}]   ;;  %s675_s4 = inlined_call_operand.vmem [shape: f32[1,128], index: 4, kind: input, shape index: {}]   ;;  %s676_s6 = inlined_call_operand.vmem [shape: f32[1,128], index: 6, kind: input, shape index: {}]   ;;  %s677_s7 = inlined_call_operand.vmem [shape: f32[16,128], index: 7, kind: output, shape index: {}]  }
   0x1   :  { %v34_v0 = vld [vmem:[%s670_s3] sm:$0xff]  ;;  %v35_v1 = vld [vmem:[%s670_s3 + $0x8] sm:$0xff]  ;;  %v36_v2 = vld [vmem:[%s670_s3 + $0x10] sm:$0xff] }
   0x2   :  { %v442_v3 = vpack.c.bf16 %v35_v1, %v34_v0  ;;  %v37_v4 = vld [vmem:[%s670_s3 + $0x18] sm:$0xff]  ;;  %v38_v6 = vld [vmem:[%s670_s3 + $0x20] sm:$0xff]  ;;  %v39_v7 = vld [vmem:[%s670_s3 + $0x28] sm:$0xff] }
   0x3   :  { %v446_v5 = vpack.c.bf16 %v37_v4, %v36_v2  ;;  %v32_v8 = vld [vmem:[%s671_s1] sm:$0xff]  ;;  %v450_v9 = vpack.c.bf16 %v39_v7, %v38_v6  ;;  %v40_v10 = vld [vmem:[%s670_s3 + $0x30] sm:$0xff]  ;;  %v41_v11 = vld [vmem:[%s670_s3 + $0x38] sm:$0xff] }
   0x4   :  { %443 = vmatprep.subr.bf16.mxu0 %v442_v3  ;;  %393 = vmatprep.mubr.msk.f32.mxu0 %vm46_vm0, %v32_v8  ;;  %v221_v12 = vld [vmem:[%s672_s5] sm:$0xff]  ;;  %v222_v13 = vld [vmem:[%s672_s5 + $0x8] sm:$0xff]  ;;  %v223_v14 = vld [vmem:[%s672_s5 + $0x10] sm:$0xff]  ;;  %v454_v18 = vpack.c.bf16 %v41_v11, %v40_v10 }
   0x5   :  { %445 = vmatpush3.bf16.msra.mxu0 %v442_v3  ;;  %v224_v15 = vld [vmem:[%s672_s5 + $0x18] sm:$0xff]  ;;  %v474_v16 = vpack.c.bf16 %v222_v13, %v221_v12  ;;  %v225_v19 = vld [vmem:[%s672_s5 + $0x20] sm:$0xff]  ;;  %v226_v20 = vld [vmem:[%s672_s5 + $0x28] sm:$0xff] }
   0x6   :  { %447 = vmatprep.subr.bf16.mxu0 %v446_v5  ;;  %v478_v17 = vpack.c.bf16 %v224_v15, %v223_v14  ;;  %v42_v21 = vld [vmem:[%s670_s3 + $0x40] sm:$0xff]  ;;  %v43_v22 = vld [vmem:[%s670_s3 + $0x48] sm:$0xff]  ;;  %v482_v23 = vpack.c.bf16 %v226_v20, %v225_v19  ;;  %v227_v25 = vld [vmem:[%s672_s5 + $0x30] sm:$0xff] }
   0x7   :  { %475 = vmatprep.subr.bf16.mxu1 %v474_v16  ;;  %v458_v24 = vpack.c.bf16 %v43_v22, %v42_v21  ;;  %v228_v26 = vld [vmem:[%s672_s5 + $0x38] sm:$0xff]  ;;  %v44_v27 = vld [vmem:[%s670_s3 + $0x50] sm:$0xff]  ;;  %v229_v31 = vld [vmem:[%s672_s5 + $0x40] sm:$0xff] }
   0x8   :  { %477 = vmatpush3.bf16.msra.mxu1 %v474_v16  ;;  %v45_v28 = vld [vmem:[%s670_s3 + $0x58] sm:$0xff]  ;;  %v486_v29 = vpack.c.bf16 %v228_v26, %v227_v25  ;;  %v230_v32 = vld [vmem:[%s672_s5 + $0x48] sm:$0xff]  ;;  %v28_v33 = vld [vmem:[%s673_s2] sm:$0xff] }
   0x9   :  { %449 = vmatpush3.bf16.msra.mxu0 %v446_v5  ;;  %479 = vmatprep.subr.bf16.mxu1 %v478_v17  ;;  %v462_v30 = vpack.c.bf16 %v45_v28, %v44_v27  ;;  %v29_v34 = vld [vmem:[%s673_s2 + $0x8] sm:$0xff]  ;;  %v490_v35 = vpack.c.bf16 %v230_v32, %v229_v31  ;;  %v30_v37 = vld [vmem:[%s673_s2 + $0x10] sm:$0xff]  ;;  %v31_v38 = vld [vmem:[%s673_s2 + $0x18] sm:$0xff] }
   0xa   :  { %451 = vmatprep.subr.bf16.mxu0 %v450_v9  ;;  %v466_v36 = vpack.c.bf16 %v29_v34, %v28_v33  ;;  %v231_v39 = vld [vmem:[%s672_s5 + $0x50] sm:$0xff]  ;;  %v232_v40 = vld [vmem:[%s672_s5 + $0x58] sm:$0xff]  ;;  %v33_v41 = vld [vmem:[%s671_s1 + $0x8] sm:$0xff]  ;;  %v470_v42 = vpack.c.bf16 %v31_v38, %v30_v37 }
   0xb   :  { %v26_v43 = vld [vmem:[%s674_s0] sm:$0xff]  ;;  %v494_v44 = vpack.c.bf16 %v232_v40, %v231_v39  ;;  %v234_v46 = vld [vmem:[%s672_s5 + $0x68] sm:$0xff]  ;;  %v235_v49 = vld [vmem:[%s672_s5 + $0x70] sm:$0xff] }
   0xc   :  { %481 = vmatpush3.bf16.msra.mxu1 %v478_v17  ;;  %v233_v45 = vld [vmem:[%s672_s5 + $0x60] sm:$0xff]  ;;  %v27_v48 = vld [vmem:[%s674_s0 + $0x8] sm:$0xff]  ;;  %v236_v50 = vld [vmem:[%s672_s5 + $0x78] sm:$0xff] }
   0xd   :  { %453 = vmatpush3.bf16.msra.mxu0 %v450_v9  ;;  %483 = vmatprep.subr.bf16.mxu1 %v482_v23  ;;  %v498_v47 = vpack.c.bf16 %v234_v46, %v233_v45  ;;  %v502_v51 = vpack.c.bf16 %v236_v50, %v235_v49  ;;  %v329_v52 = vld [vmem:[%s675_s4] ss:$0 sm:$0xff] }
   0xe   :  { %455 = vmatprep.subr.bf16.mxu0 %v454_v18  ;;  %v330_v59 = vld [vmem:[%s676_s6] ss:$0 sm:$0xff] }
  0x10   :  { %485 = vmatpush3.bf16.msra.mxu1 %v482_v23 }
  0x11   :  { %457 = vmatpush3.bf16.msra.mxu0 %v454_v18  ;;  %487 = vmatprep.subr.bf16.mxu1 %v486_v29 }
  0x12   :  { %459 = vmatprep.subr.bf16.mxu0 %v458_v24 }
  0x14   :  { %489 = vmatpush3.bf16.msra.mxu1 %v486_v29 }
  0x15   :  { %461 = vmatpush3.bf16.msra.mxu0 %v458_v24  ;;  %491 = vmatprep.subr.bf16.mxu1 %v490_v35 }
  0x16   :  { %463 = vmatprep.subr.bf16.mxu0 %v462_v30 }
  0x18   :  { %493 = vmatpush3.bf16.msra.mxu1 %v490_v35 }
  0x19   :  { %465 = vmatpush3.bf16.msra.mxu0 %v462_v30  ;;  %495 = vmatprep.subr.bf16.mxu1 %v494_v44 }
  0x1a   :  { %467 = vmatprep.subr.bf16.mxu0 %v466_v36 }
  0x1c   :  { %394 = vmatmul.mubr.msk.f32.vlgmr.msra.gmra.mrb[0].mxu0 %vm46_vm0, %v33_v41  ;;  %497 = vmatpush3.bf16.msra.mxu1 %v494_v44 }
  0x1d   :  { %469 = vmatpush3.bf16.msra.mxu0 %v466_v36  ;;  %404 = vmatprep.mubr.msk.f32.mxu0 %vm128_vm1, %v26_v43 }
  0x1e   :  { %471 = vmatprep.subr.bf16.mxu0 %v470_v42  ;;  %499 = vmatprep.subr.bf16.mxu1 %v498_v47 }
  0x20   :  { %501 = vmatpush3.bf16.msra.mxu1 %v498_v47 }
  0x21   :  { %473 = vmatpush3.bf16.msra.mxu0 %v470_v42  ;;  %503 = vmatprep.subr.bf16.mxu1 %v502_v51 }
  0x24   :  { %405 = vmatmul.mubr.msk.f32.vlgmr.msra.gmra.mrb[0].mxu0 %vm128_vm1, %v27_v48  ;;  %505 = vmatpush3.bf16.msra.mxu1 %v502_v51 }
  0xf7   :  { %v406_v53 = vpop.f32.mrb[0].mxu0 }
  0xf8   :  { %v218_v54 = vadd.f32 %v406_v53, %v329_v52  ;;  %v201_v55 = vpop.f32.mrb[1].mxu0 }
  0xf9   :  { %v217_v56 = vadd.f32 %v329_v52, %v201_v55 }
  0xfa   :  { %v220_v58 = vmax.f32 %v218_v54, 0.0 }
  0xfb   :  { %v219_v57 = vmax.f32 %v217_v56, 0.0 }
  0xfd   :  { %439 = vmatprep.mubr.f32.mxu1 %v219_v57 }
  0xfe   :  { %440 = vmatmul.mubr.f32.vlgmr.msra.gmra.mrb[0].mxu1 %v220_v58 }
 0x1d1   :  { %v441_v60 = vpop.f32.mrb[0].mxu1 }
 0x1d2   :  { %v316_v61 = vadd.f32 %v441_v60, %v330_v59  ;;  %v310_v62 = vpop.f32.mrb[1].mxu1 }
 0x1d3   :  { %v311_v63 = vadd.f32 %v330_v59, %v310_v62 }
 0x1d4   :  { %320 = vst [vmem:[%s677_s7 + $0x8] sm:$0xff] %v316_v61 }
 0x1d5   :  { %319 = vst [vmem:[%s677_s7] sm:$0xff] %v311_v63 }

</bundles_post_ra>
